<compile_context>
chip_gen: v6e
topology: v6e:2x2x1
jax: 0.10.0
libtpu: 0.0.40
codegen_flags: <defaults>
</compile_context>

<pallas_src>
import functools
import math

import jax
import jax.numpy as jnp
import numpy as np
from jax.experimental import pallas as pl
from jax.experimental.pallas import tpu as pltpu


def _round_up(v, m):
    return -(-v // m) * m


def _const_spec(shape):
    return pl.BlockSpec(shape, lambda i: (0,) * len(shape))


# ----------------------------------------------------------------------------
# Kernel 1: generic 2-layer MLP  out = tanh(x @ W1 + b1) @ W2 + b2
# Row-tiled: one grid step handles `tm` rows; weights stay resident.
# ----------------------------------------------------------------------------
def _mlp2_kernel(x_ref, w1_ref, b1_ref, w2_ref, b2_ref, o_ref):
    x = x_ref[...]
    h = jnp.tanh(
        jnp.dot(x, w1_ref[...], preferred_element_type=jnp.float32) + b1_ref[...]
    )
    o_ref[...] = (
        jnp.dot(h, w2_ref[...], preferred_element_type=jnp.float32) + b2_ref[...]
    )


def run_mlp2(x, w1, b1, w2, b2, tm=512):
    m, in_dim = x.shape
    out_dim = w2.shape[1]
    tm = min(tm, _round_up(m, 8))
    m_pad = _round_up(m, tm)
    if m_pad != m:
        x = jnp.pad(x, ((0, m_pad - m), (0, 0)))
    out = pl.pallas_call(
        _mlp2_kernel,
        out_shape=jax.ShapeDtypeStruct((m_pad, out_dim), jnp.float32),
        grid=(m_pad // tm,),
        in_specs=[
            pl.BlockSpec((tm, in_dim), lambda i: (i, 0)),
            _const_spec(w1.shape),
            _const_spec(b1.shape),
            _const_spec(w2.shape),
            _const_spec(b2.shape),
        ],
        out_specs=pl.BlockSpec((tm, out_dim), lambda i: (i, 0)),
        compiler_params=pltpu.CompilerParams(dimension_semantics=("parallel",)),
    )(x, w1, b1, w2, b2)
    return out[:m]


# ----------------------------------------------------------------------------
# Kernel 2: all heads + combine MLP, TS samples per grid step.
#   logits of all heads:  one (M, enc) @ (enc, H*hid)  + one block-diag matmul
#   values of all heads:  one (M, enc) @ (enc, H*hid)  + one block-diag matmul
#   masked softmax over coords, weighted reduction via MXU head->inner_dim
#   expansion, combine MLP fused at the end.
# ----------------------------------------------------------------------------
def _heads_kernel(
    x_ref, madd_ref,
    w1w_ref, b1w_ref, w2w_ref, b2w_ref,
    w1v_ref, b1v_ref, w2v_ref, b2v_ref,
    e_ref,
    w1c_ref, b1c_ref, w2c_ref, b2c_ref,
    o_ref, *, inv_sqrt_enc,
):
    ts, f, enc = x_ref.shape
    n_heads = w2w_ref.shape[1]
    inner_dim = w2v_ref.shape[1]

    x = x_ref[...].reshape(ts * f, enc)            # (M, enc), M = TS*n_coords

    # --- attention logits for all heads at once ---------------------------
    hw = jnp.tanh(
        jnp.dot(x, w1w_ref[...], preferred_element_type=jnp.float32) + b1w_ref[...]
    )                                              # (M, n_heads*hidden)
    logits = (
        jnp.dot(hw, w2w_ref[...], preferred_element_type=jnp.float32) + b2w_ref[...]
    )                                              # (M, n_heads)
    logits = logits * inv_sqrt_enc
    logits = logits.reshape(ts, f, n_heads) + madd_ref[...]   # additive -inf mask
    logits = logits - jnp.max(logits, axis=1, keepdims=True)
    p = jnp.exp(logits)
    w = p / jnp.sum(p, axis=1, keepdims=True)      # (TS, F, n_heads)

    # --- values for all heads at once --------------------------------------
    hv = jnp.tanh(
        jnp.dot(x, w1v_ref[...], preferred_element_type=jnp.float32) + b1v_ref[...]
    )                                              # (M, n_heads*hidden)
    vals = (
        jnp.dot(hv, w2v_ref[...], preferred_element_type=jnp.float32) + b2v_ref[...]
    )                                              # (M, inner_dim)

    # --- weighted reduction over coords -------------------------------------
    # expand per-head weights to inner_dim columns on the lane axis (MXU),
    # then multiply + sublane-reduce over the coord axis.
    wexp = jnp.dot(
        w.reshape(ts * f, n_heads), e_ref[...], preferred_element_type=jnp.float32
    )                                              # (M, inner_dim)
    res = jnp.sum((wexp * vals).reshape(ts, f, inner_dim), axis=1)  # (TS, inner_dim)

    # --- combine MLP ---------------------------------------------------------
    hc = jnp.tanh(
        jnp.dot(res, w1c_ref[...], preferred_element_type=jnp.float32) + b1c_ref[...]
    )
    o_ref[...] = (
        jnp.dot(hc, w2c_ref[...], preferred_element_type=jnp.float32) + b2c_ref[...]
    )


def run_heads(inputs, madd, hw_params, hv_params, comb_params, e_mat, p_out, ts=8):
    n_samples, n_coords, enc_dim = inputs.shape
    if n_samples <= ts:
        ts = n_samples
    else:
        ts = max(8, (ts // 8) * 8)                 # keep output block sublane-aligned
    n_pad = _round_up(n_samples, ts)
    if n_pad != n_samples:
        pad = n_pad - n_samples
        inputs = jnp.pad(inputs, ((0, pad), (0, 0), (0, 0)))
        madd = jnp.pad(madd, ((0, pad), (0, 0), (0, 0)))   # padded samples: all valid

    w1w, b1w, w2w, b2w = hw_params
    w1v, b1v, w2v, b2v = hv_params
    w1c, b1c, w2c, b2c = comb_params

    kernel = functools.partial(
        _heads_kernel, inv_sqrt_enc=1.0 / math.sqrt(enc_dim)
    )
    out = pl.pallas_call(
        kernel,
        out_shape=jax.ShapeDtypeStruct((n_pad, p_out), jnp.float32),
        grid=(n_pad // ts,),
        in_specs=[
            pl.BlockSpec((ts, n_coords, enc_dim), lambda i: (i, 0, 0)),
            pl.BlockSpec((ts, n_coords, 1), lambda i: (i, 0, 0)),
            _const_spec(w1w.shape), _const_spec(b1w.shape),
            _const_spec(w2w.shape), _const_spec(b2w.shape),
            _const_spec(w1v.shape), _const_spec(b1v.shape),
            _const_spec(w2v.shape), _const_spec(b2v.shape),
            _const_spec(e_mat.shape),
            _const_spec(w1c.shape), _const_spec(b1c.shape),
            _const_spec(w2c.shape), _const_spec(b2c.shape),
        ],
        out_specs=pl.BlockSpec((ts, p_out), lambda i: (i, 0)),
        compiler_params=pltpu.CompilerParams(dimension_semantics=("parallel",)),
    )(inputs, madd,
      w1w, b1w, w2w, b2w,
      w1v, b1v, w2v, b2v,
      e_mat,
      w1c, b1c, w2c, b2c)
    return out[:n_samples]


# ----------------------------------------------------------------------------
# Host-side weight prepacking for the fused heads kernel.
# ----------------------------------------------------------------------------
def _block_diag(w):
    # w: (n_heads, a, b) -> block-diagonal (n_heads*a, n_heads*b)
    n_heads, a, b = w.shape
    eye = jnp.eye(n_heads, dtype=w.dtype)
    return jnp.einsum("hab,hg->hagb", w, eye).reshape(n_heads * a, n_heads * b)


def _prepack_heads(head_params):
    w1, b1, w2, b2 = head_params          # (H,in,hid), (H,1,hid), (H,hid,out), (H,1,out)
    n_heads, in_dim, hidden = w1.shape
    out_dim = w2.shape[-1]
    w1_all = jnp.transpose(w1, (1, 0, 2)).reshape(in_dim, n_heads * hidden)
    b1_all = b1.reshape(1, n_heads * hidden)
    w2_blk = _block_diag(w2)                                  # (H*hid, H*out)
    b2_all = b2.reshape(1, n_heads * out_dim)
    return w1_all, b1_all, w2_blk, b2_all


# ----------------------------------------------------------------------------
# Full VidonBranchNet forward (Pallas kernels + JAX glue for the gather).
# ----------------------------------------------------------------------------
def vidon_branch_forward(coords, coord_inds, values, params,
                         n_heads, enc_dim, inner_dim, p_out):
    n_samples, n_coords, sensor_dim = values.shape
    h_size = inner_dim // n_heads
    mask = coord_inds == -1                                   # (s, f)

    # lift MLPs (row-tiled Pallas matmul kernels)
    lifted_coords = run_mlp2(coords, *params["lift_coords"])  # (n_points, enc)
    lifted_values = run_mlp2(
        values.reshape(n_samples * n_coords, sensor_dim), *params["lift_values"]
    ).reshape(n_samples, n_coords, enc_dim)

    # take_along_dim gather (data-dependent indexing kept in XLA glue)
    # TODO(synk): fuse gather+add into the heads kernel (keep lifted_coords
    # VMEM-resident) to avoid the (s, f, enc) HBM round-trip at large scale.
    safe_inds = jnp.where(mask, 0, coord_inds).reshape(-1)
    gathered = jnp.take(lifted_coords, safe_inds, axis=0).reshape(
        n_samples, n_coords, enc_dim
    )
    inputs = gathered + lifted_values

    # stacked / block-diagonal head weights + head->inner_dim expansion matrix
    hw_params = _prepack_heads(params["heads_weights"])       # logits path
    hv_params = _prepack_heads(params["heads_values"])        # values path
    e_mat = jnp.repeat(jnp.eye(n_heads, dtype=jnp.float32), h_size, axis=1)

    # additive softmax mask: -inf on padded coords (shape (s, f, 1))
    madd = jnp.where(mask, -jnp.inf, 0.0).astype(jnp.float32)[..., None]

    return run_heads(inputs, madd, hw_params, hv_params, params["combine"],
                     e_mat, p_out)


# ----------------------------------------------------------------------------
# Pure-JAX reference (mirrors the PyTorch forward) for validation.
# ----------------------------------------------------------------------------
def _mlp2_ref(x, w1, b1, w2, b2):
    return jnp.tanh(x @ w1 + b1) @ w2 + b2


def reference_forward(coords, coord_inds, values, params,
                      n_heads, enc_dim, inner_dim, p_out):
    n_samples, n_coords, sensor_dim = values.shape
    mask = coord_inds == -1
    lc = _mlp2_ref(coords, *params["lift_coords"])
    lv = _mlp2_ref(values.reshape(-1, sensor_dim), *params["lift_values"]).reshape(
        n_samples, n_coords, enc_dim
    )
    safe = jnp.where(mask, 0, coord_inds).reshape(-1)
    g = jnp.take(lc, safe, axis=0).reshape(n_samples, n_coords, enc_dim)
    inputs = g + lv

    w1w, b1w, w2w, b2w = params["heads_weights"]
    w1v, b1v, w2v, b2v = params["heads_values"]
    outs = []
    for h in range(n_heads):
        w = _mlp2_ref(inputs, w1w[h], b1w[h], w2w[h], b2w[h])      # (s, f, 1)
        w = w / math.sqrt(enc_dim)
        w = jnp.where(mask[..., None], -jnp.inf, w)
        w = jax.nn.softmax(w, axis=1)
        v = _mlp2_ref(inputs, w1v[h], b1v[h], w2v[h], b2v[h])      # (s, f, hsz)
        outs.append(jnp.einsum("sf,sfp->sp", w[..., 0], v))
    res = jnp.concatenate(outs, axis=-1)                           # (s, inner_dim)
    return _mlp2_ref(res, *params["combine"])


# ----------------------------------------------------------------------------
# Deterministic parameter init + demo
# ----------------------------------------------------------------------------
def init_params(key, coord_dim, sensor_dim, enc_dim, inner_dim, p_out, n_heads,
                hidden):
    def lin(k, fan_in, shape):
        return jax.random.normal(k, shape, jnp.float32) / math.sqrt(fan_in)

    ks = iter(jax.random.split(key, 32))
    h_size = inner_dim // n_heads

    def mlp2(in_d, out_d):
        return (
            lin(next(ks), in_d, (in_d, hidden)),
            lin(next(ks), in_d, (1, hidden)),
            lin(next(ks), hidden, (hidden, out_d)),
            lin(next(ks), hidden, (1, out_d)),
        )

    def stacked_mlp2(in_d, out_d):
        return (
            lin(next(ks), in_d, (n_heads, in_d, hidden)),
            lin(next(ks), in_d, (n_heads, 1, hidden)),
            lin(next(ks), hidden, (n_heads, hidden, out_d)),
            lin(next(ks), hidden, (n_heads, 1, out_d)),
        )

    return {
        "lift_coords": mlp2(coord_dim, enc_dim),
        "lift_values": mlp2(sensor_dim, enc_dim),
        "heads_weights": stacked_mlp2(enc_dim, 1),
        "heads_values": stacked_mlp2(enc_dim, h_size),
        "combine": mlp2(inner_dim, p_out),
    }


if __name__ == "__main__":
    # module hyperparameters (small, consistent with VidonBranchNet.__init__)
    coord_dim, sensor_dim = 2, 3
    enc_dim, inner_dim, p_out, n_heads = 32, 32, 8, 4
    hidden = 32                       # neurons_* = [32] for every MLP, act = tanh
    n_samples, n_coords, n_points = 16, 16, 24

    key = jax.random.PRNGKey(0)
    k_par, k_coord, k_val, k_idx = jax.random.split(key, 4)

    params = init_params(k_par, coord_dim, sensor_dim, enc_dim, inner_dim,
                         p_out, n_heads, hidden)

    coords = jax.random.normal(k_coord, (n_points, coord_dim), jnp.float32)
    values = jax.random.normal(k_val, (n_samples, n_coords, sensor_dim), jnp.float32)
    coord_inds = jax.random.randint(k_idx, (n_samples, n_coords), 0, n_points,
                                    dtype=jnp.int32)
    # mark the last 3 points of every sample as zero-padded (-1)
    coord_inds = coord_inds.at[:, -3:].set(-1)

    out = vidon_branch_forward(coords, coord_inds, values, params,
                               n_heads, enc_dim, inner_dim, p_out)
    out = jax.block_until_ready(out)

    ref = reference_forward(coords, coord_inds, values, params,
                            n_heads, enc_dim, inner_dim, p_out)
    np.testing.assert_allclose(np.asarray(out), np.asarray(ref),
                               rtol=2e-4, atol=1e-5)
    assert out.shape == (n_samples, p_out)
    print("KERNEL_OK")
</pallas_src>

<mosaic_0001>
module attributes {stable_mosaic.version = 11 : i64} {
  func.func @_mlp2_kernel(%arg0: i32, %arg1: memref<24x2xf32, #tpu.memory_space<vmem>>, %arg2: memref<2x32xf32, #tpu.memory_space<vmem>>, %arg3: memref<1x32xf32, #tpu.memory_space<vmem>>, %arg4: memref<32x32xf32, #tpu.memory_space<vmem>>, %arg5: memref<1x32xf32, #tpu.memory_space<vmem>>, %arg6: memref<24x32xf32, #tpu.memory_space<vmem>>) attributes {dimension_semantics = [#tpu.dimension_semantics<parallel>], iteration_bounds = array<i64: 1>, scalar_prefetch = 0 : i64, scratch_operands = 0 : i64, tpu.core_type = #tpu.core_type<tc>, window_params = [{transform_indices = @transform_0, window_bounds = array<i64: 24, 2>}, {pipeline_mode = #tpu.pipeline_mode<synchronous>, transform_indices = @transform_1, window_bounds = array<i64: 2, 32>}, {pipeline_mode = #tpu.pipeline_mode<synchronous>, transform_indices = @transform_2, window_bounds = array<i64: 1, 32>}, {pipeline_mode = #tpu.pipeline_mode<synchronous>, transform_indices = @transform_3, window_bounds = array<i64: 32, 32>}, {pipeline_mode = #tpu.pipeline_mode<synchronous>, transform_indices = @transform_4, window_bounds = array<i64: 1, 32>}, {transform_indices = @transform_5, window_bounds = array<i64: 24, 32>}]} {
    %c0 = arith.constant 0 : index
    %c0_0 = arith.constant 0 : index
    %0 = vector.load %arg1[%c0, %c0_0] : memref<24x2xf32, #tpu.memory_space<vmem>>, vector<24x2xf32>
    %c0_1 = arith.constant 0 : index
    %c0_2 = arith.constant 0 : index
    %1 = vector.load %arg2[%c0_1, %c0_2] : memref<2x32xf32, #tpu.memory_space<vmem>>, vector<2x32xf32>
    %cst = arith.constant dense<0.000000e+00> : vector<24x32xf32>
    %2 = tpu.matmul %0, %1, %cst {dimension_numbers = #tpu.dot_dimension_numbers<[1], [0], [0], [1], [0, 0, 1, 1], [], []>} : vector<24x2xf32>, vector<2x32xf32>, vector<24x32xf32> -> vector<24x32xf32>
    %c0_3 = arith.constant 0 : index
    %c0_4 = arith.constant 0 : index
    %3 = vector.load %arg3[%c0_3, %c0_4] : memref<1x32xf32, #tpu.memory_space<vmem>>, vector<1x32xf32>
    %4 = vector.broadcast %3 : vector<1x32xf32> to vector<24x32xf32>
    %5 = arith.addf %2, %4 : vector<24x32xf32>
    %6 = math.tanh %5 : vector<24x32xf32>
    %c0_5 = arith.constant 0 : index
    %c0_6 = arith.constant 0 : index
    %7 = vector.load %arg4[%c0_5, %c0_6] : memref<32x32xf32, #tpu.memory_space<vmem>>, vector<32x32xf32>
    %cst_7 = arith.constant dense<0.000000e+00> : vector<24x32xf32>
    %8 = tpu.matmul %6, %7, %cst_7 {dimension_numbers = #tpu.dot_dimension_numbers<[1], [0], [0], [1], [0, 0, 1, 1], [], []>} : vector<24x32xf32>, vector<32x32xf32>, vector<24x32xf32> -> vector<24x32xf32>
    %c0_8 = arith.constant 0 : index
    %c0_9 = arith.constant 0 : index
    %9 = vector.load %arg5[%c0_8, %c0_9] : memref<1x32xf32, #tpu.memory_space<vmem>>, vector<1x32xf32>
    %10 = vector.broadcast %9 : vector<1x32xf32> to vector<24x32xf32>
    %11 = arith.addf %8, %10 : vector<24x32xf32>
    %c0_10 = arith.constant 0 : index
    %c0_11 = arith.constant 0 : index
    %12 = vector.load %arg6[%c0_10, %c0_11] : memref<24x32xf32, #tpu.memory_space<vmem>>, vector<24x32xf32>
    tpu.vector_store %arg6[%c0_10, %c0_11], %11 {strides = array<i32>} : memref<24x32xf32, #tpu.memory_space<vmem>>, vector<24x32xf32>,
    return
  }
  func.func @transform_0(%arg0: i32) -> (i32, i32) {
    %c0_i32 = arith.constant 0 : i32
    %c0_i32_0 = arith.constant 0 : i32
    return %arg0, %c0_i32 : i32, i32
  }
  func.func @transform_1(%arg0: i32) -> (i32, i32) {
    %c0_i32 = arith.constant 0 : i32
    %c0_i32_0 = arith.constant 0 : i32
    %c0_i32_1 = arith.constant 0 : i32
    return %c0_i32, %c0_i32_0 : i32, i32
  }
  func.func @transform_2(%arg0: i32) -> (i32, i32) {
    %c0_i32 = arith.constant 0 : i32
    %c0_i32_0 = arith.constant 0 : i32
    %c0_i32_1 = arith.constant 0 : i32
    return %c0_i32, %c0_i32_0 : i32, i32
  }
  func.func @transform_3(%arg0: i32) -> (i32, i32) {
    %c0_i32 = arith.constant 0 : i32
    %c0_i32_0 = arith.constant 0 : i32
    %c0_i32_1 = arith.constant 0 : i32
    return %c0_i32, %c0_i32_0 : i32, i32
  }
  func.func @transform_4(%arg0: i32) -> (i32, i32) {
    %c0_i32 = arith.constant 0 : i32
    %c0_i32_0 = arith.constant 0 : i32
    %c0_i32_1 = arith.constant 0 : i32
    return %c0_i32, %c0_i32_0 : i32, i32
  }
  func.func @transform_5(%arg0: i32) -> (i32, i32) {
    %c0_i32 = arith.constant 0 : i32
    %c0_i32_0 = arith.constant 0 : i32
    return %arg0, %c0_i32 : i32, i32
  }
}

</mosaic_0001>

<bundles_post_ra>
// kernel: tpu_custom_call.1
= control target key start
LH: loop header
LB: loop body
LE: loop exit
PB: predicated region body
PF: predicated region fallthrough
CT: control target
= control target key end

     0   :  { %10 = vsyncpa [#allocation3], 0  ;;  %s446_s0 = inlined_call_operand.vmem [shape: f32[24,2], index: 0, kind: input, shape index: {}]   ;;  %s447_s1 = inlined_call_operand.vmem [shape: f32[2,32], index: 1, kind: input, shape index: {}]   ;;  %s448_s2 = inlined_call_operand.vmem [shape: f32[1,32], index: 2, kind: input, shape index: {}]   ;;  %s449_s3 = inlined_call_operand.hbm [shape: f32[32,32], index: 3, kind: input, shape index: {}]   ;;  %s450_s4 = inlined_call_operand.vmem [shape: f32[1,32], index: 4, kind: input, shape index: {}]   ;;  %s451_s5 = inlined_call_operand.hbm [shape: f32[24,32], index: 5, kind: output, shape index: {}]  }
   0x1   :  { %11 = vsyncpa [#allocation4], 0  ;;  %s368_s18 = smov [#allocation2]  }
   0x2   :  { %s23_s19 = sshll.u32 %s368_s18, 4  ;;  %s24_s19 = int_to_ptr.vmem [resolvable:$true] %s23_s19 }
   0x3   :  { %s332_s20 = scalar_lea.vmem %s24_s19, 512  ;;  %p337_p1 = scmp.lt.s32.totalorder %s24_s19, %s24_s19 }
   0x4   :  { %p333_p0 = scmp.ne.s32.totalorder %s24_s19, %s332_s20  ;;  %p338_p2 = scmp.lt.s32.totalorder %s332_s20, %s332_s20 }
   0x6   :  { %p339_p3 = por %p338_p2, %p337_p1 }
   0x8   :  { %p340_p4 = pnand %p339_p3, %p333_p0 }
   0xa   :  { %343 = shalt.err (!%p340_p4)
}
   0xb   :  { %s369_s21 = smov 128   ;;  %s370_s22 = smov 8  }
   0xc   :  { %29 = dma.hbm_to_vmem [thread:$0]  %s449_s3, 512, %s24_s19, [#allocation3], %s369_s21, %s369_s21, %s370_s22  }
   0xd   :  { %364 = dma.done.wait [#allocation3], 512  }
   0xe   :  { %365 = vsyncadd [#allocation3], 4294966784  ;;  %v371_v0 = vmov 0.0   ;;  %vm372_vm0 = vmmov 0   ;;  %vm56_vm1 = vcmask 1041408   ;;  %vm46_vm2 = vcmask 15360  }
   0xf   :  { %284 = vmatprep.subr.mxu0 %v371_v0  ;;  %286 = vmatprep.mubr.msk.f32.mxu0 %vm372_vm0, %v371_v0  ;;  %v38_v1 = vld [vmem:[%s447_s1] sm:$0x3]  ;;  %v36_v3 = vld [vmem:[%s446_s0 + $0x8] sm:$0xff]  ;;  %v37_v4 = vld [vmem:[%s446_s0 + $0x10] sm:$0xff]  ;;  %vm154_vm3 = vcmask 261120   ;;  %s373_s8 = smov [#allocation5]  }
  0x10   :  { %295 = vmatprep.subr.mxu1 %v371_v0  ;;  %303 = vmatprep.mubr.msk.f32.mxu1 %vm372_vm0, %v371_v0  ;;  %v35_v2 = vld [vmem:[%s446_s0] sm:$0xff]  ;;  %v146_v5 = vld [vmem:[#allocation2 + $0x18] sm:$0xff]  ;;  %v145_v6 = vld [vmem:[#allocation2 + $0x10] sm:$0xff]  ;;  %s252_s9 = sshll.u32 %s373_s8, 4  ;;  %s253_s9 = int_to_ptr.vmem [resolvable:$true] %s252_s9 }
  0x11   :  { %285 = vmatpush3.msk.msra.mxu0 %vm56_vm1, %v38_v1  ;;  %296 = vmatpush3.msra.mxu1 %v146_v5  ;;  %v144_v7 = vld [vmem:[#allocation2 + $0x8] sm:$0xff]  ;;  %v143_v8 = vld [vmem:[#allocation2] sm:$0xff]  ;;  %s344_s10 = scalar_lea.vmem %s253_s9, 384  ;;  %p349_p6 = scmp.lt.s32.totalorder %s253_s9, %s253_s9 }
  0x12   :  { %287 = vmatmul.mubr.msk.f32.vlgmr.msra.gmra.mxu0 %vm46_vm2, %v35_v2  ;;  %297 = vmatprep.subr.mxu1 %v371_v0  ;;  %v264_v9 = vld [vmem:[%s448_s2] ss:$0 sm:$0xff]  ;;  %p345_p5 = scmp.ne.s32.totalorder %s253_s9, %s344_s10  ;;  %p350_p7 = scmp.lt.s32.totalorder %s344_s10, %s344_s10 }
  0x13   :  { %289 = vmatprep.mubr.msk.f32.mxu0 %vm372_vm0, %v371_v0  ;;  %298 = vmatpush3.msra.mxu1 %v145_v6  ;;  %v269_v22 = vld [vmem:[%s450_s4] ss:$0 sm:$0xff] }
  0x14   :  { %299 = vmatprep.subr.mxu1 %v371_v0  ;;  %p351_p8 = por %p350_p7, %p349_p6 }
  0x15   :  { %300 = vmatpush3.msra.mxu1 %v144_v7 }
  0x16   :  { %290 = vmatmul.mubr.msk.f32.gmra.mxu0 %vm46_vm2, %v36_v3  ;;  %301 = vmatprep.subr.mxu1 %v371_v0  ;;  %p352_p9 = pnand %p351_p8, %p345_p5 }
  0x17   :  { %292 = vmatprep.mubr.msk.f32.mxu0 %vm372_vm0, %v371_v0  ;;  %302 = vmatpush3.msra.mxu1 %v143_v8 }
  0x1a   :  { %293 = vmatmul.mubr.msk.f32.gmra.mxu0 %vm46_vm2, %v37_v4 }
  0xd2   :  { %v126_v10 = vpop.f32.mrf.mxu0 }
  0xd3   :  { %v127_v11 = vadd.f32 %v264_v9, %v126_v10 }
  0xd4   :  { %v288_v12 = vpop.f32.mrf.mxu0 }
  0xd5   :  { %318 = vtanh.f32 %v127_v11 }
  0xd6   :  { %v131_v13 = vpop.f32.mrf.mxu0 }
  0xd7   :  { %v132_v14 = vadd.f32 %v264_v9, %v131_v13 }
  0xd8   :  { %v291_v15 = vpop.f32.mrf.mxu0 }
  0xd9   :  { %320 = vtanh.f32 %v132_v14 }
  0xda   :  { %v136_v16 = vpop.f32.mrf.mxu0 }
  0xdb   :  { %v137_v17 = vadd.f32 %v264_v9, %v136_v16 }
  0xdc   :  { %v294_v18 = vpop.f32.mrf.mxu0 }
  0xdd   :  { %322 = vtanh.f32 %v137_v17 }
  0xe2   :  { %v319_v19 = vpop.eup %318 }
  0xe3   :  { %304 = vmatmul.mubr.msk.f32.vlgmr.msra.gmra.mxu1 %vm154_vm3, %v319_v19 }
  0xe4   :  { %306 = vmatprep.mubr.msk.f32.mxu1 %vm372_vm0, %v371_v0 }
  0xe6   :  { %v321_v20 = vpop.eup %320 }
  0xe7   :  { %307 = vmatmul.mubr.msk.f32.gmra.mxu1 %vm154_vm3, %v321_v20 }
  0xe8   :  { %309 = vmatprep.mubr.msk.f32.mxu1 %vm372_vm0, %v371_v0 }
  0xea   :  { %v323_v21 = vpop.eup %322 }
  0xeb   :  { %310 = vmatmul.mubr.msk.f32.gmra.mxu1 %vm154_vm3, %v323_v21 }
 0x1a3   :  { %v230_v23 = vpop.f32.mrf.mxu1 }
 0x1a4   :  { %v231_v24 = vadd.f32 %v269_v22, %v230_v23 }
 0x1a5   :  { %v305_v25 = vpop.f32.mrf.mxu1 }
 0x1a6   :  { %244 = vst.msk [vmem:[#allocation5] sm:$0xff] %vm154_vm3, %v231_v24 }
 0x1a7   :  { %v235_v26 = vpop.f32.mrf.mxu1 }
 0x1a8   :  { %v236_v27 = vadd.f32 %v269_v22, %v235_v26 }
 0x1a9   :  { %v308_v28 = vpop.f32.mrf.mxu1 }
 0x1aa   :  { %245 = vst.msk [vmem:[#allocation5 + $0x8] sm:$0xff] %vm154_vm3, %v236_v27 }
 0x1ab   :  { %v240_v29 = vpop.f32.mrf.mxu1 }
 0x1ac   :  { %v241_v30 = vadd.f32 %v269_v22, %v240_v29 }
 0x1ad   :  { %v311_v31 = vpop.f32.mrf.mxu1 }
 0x1ae   :  { %246 = vst.msk [vmem:[#allocation5 + $0x10] sm:$0xff] %vm154_vm3, %v241_v30 }
 0x1af   :  { %355 = shalt.err (!%p352_p9)
}
 0x1b0   :  { %258 = dma.vmem_to_hbm [thread:$0]  %s253_s9, 384, %s451_s5, [#allocation4], %s369_s21, %s369_s21, %s370_s22  }
 0x1b1   :  { %366 = dma.done.wait [#allocation4], 384  }
 0x1b2   :  { %367 = vsyncadd [#allocation4], 4294966912 }
 0x1b3   :  { %262 = vsyncpa [#allocation3], 1 }
 0x1b4   :  { %263 = vsyncpa [#allocation4], 1 }

</bundles_post_ra>
